<compile_context>
chip_gen: v7x
topology: tpu7x:2x2x1
jax: 0.10.0
libtpu: 0.0.40
codegen_flags: <defaults>
</compile_context>

<pallas_src>
import functools

import jax
import jax.numpy as jnp
from jax import lax
from jax.experimental import pallas as pl
from jax.experimental.pallas import tpu as pltpu


_VMEM_LIMIT_BYTES = 32 * 1024 * 1024   # >= every scoped default, <= v7x 64 MiB physical


def _round_up(x, m):
    return (x + m - 1) // m * m


def _choose_chunk(p_lane_bytes, t_lane_bytes, s_total, *,
                  vmem_budget_bytes=16 * 1024 * 1024, max_chunk=32768):
    """Lane chunk: multiple of 128, sized so both double-buffered inputs fit budget."""
    s128 = _round_up(s_total, 128)
    bytes_per_lane = 2 * (p_lane_bytes + t_lane_bytes)      # x2: double-buffered inputs
    budget_chunk = (vmem_budget_bytes // max(bytes_per_lane, 1)) // 128 * 128
    return max(128, min(s128, max(budget_chunk, 128), max_chunk))


def _gdice_sums_kernel(p_ref, t_ref, out_ref, *, n_classes, s_total, chunk,
                       n_fold, n_k_split, from_labels, any_ragged):
    """Accumulate lane-partial sums of p*y, p and y per (split, batch, class).

    Grid = (n_split, B, n_k_split): axes 0/1 are parallel (megacore), axis 2 is the
    streamed spatial reduction.  out_ref is a (1, 3, C, 128) f32 block resident
    across the reduction axis; every 128-lane slice of the chunk is folded into it
    with element-wise VPU adds (no per-step cross-lane reduce).  When `from_labels`,
    t_ref is a (1, 1, chunk) integer label slice and the one-hot is built in-kernel.
    """
    kk = pl.program_id(0) * n_k_split + pl.program_id(2)    # global chunk index

    @pl.when(pl.program_id(2) == 0)
    def _init():
        out_ref[...] = jnp.zeros_like(out_ref)

    classes = lax.broadcasted_iota(jnp.int32, (n_classes, 1), 0)     # hoisted
    lane_iota = lax.broadcasted_iota(jnp.int32, (1, 128), 1)         # hoisted

    def fold(mask_tail):
        def body(j, carry):
            lo = pl.multiple_of(j * 128, 128)
            p = p_ref[0, :, pl.ds(lo, 128)].astype(jnp.float32)      # (C, 128)
            if mask_tail:
                valid = (kk * chunk + lo + lane_iota) < s_total      # (1, 128) bool
            if from_labels:
                lab = t_ref[0, :, pl.ds(lo, 128)].astype(jnp.int32)  # (1, 128)
                onehot = lab == classes                              # (C, 128) bool
                if mask_tail:
                    p = jnp.where(valid, p, 0.0)
                    onehot = jnp.logical_and(onehot, valid)
                y = onehot.astype(jnp.float32)
            else:
                y = t_ref[0, :, pl.ds(lo, 128)].astype(jnp.float32)  # (C, 128)
                if mask_tail:
                    p = jnp.where(valid, p, 0.0)
                    y = jnp.where(valid, y, 0.0)
            out_ref[0, 0, :, :] += p * y
            out_ref[0, 1, :, :] += p
            out_ref[0, 2, :, :] += y
            return carry

        lax.fori_loop(0, n_fold, body, 0, unroll=min(8, n_fold))

    if any_ragged:
        # Only chunks that cross the end of the spatial axis (the ragged tail, or
        # duplicated chunks introduced by the core split) pay for masking.
        needs_mask = (kk + 1) * chunk > s_total

        @pl.when(needs_mask)
        def _masked():
            fold(True)

        @pl.when(jnp.logical_not(needs_mask))
        def _unmasked():
            fold(False)
    else:
        fold(False)


def gdice_loss(net_output, gt, *, apply_nonlin=None, smooth=1e-5,
               max_chunk=32768, vmem_budget_bytes=16 * 1024 * 1024):
    """Pallas port of GDiceLoss.forward: returns the per-sample gdc vector [B]."""
    shp_x = net_output.shape
    B, C = shp_x[0], shp_x[1]
    S = 1
    for d in shp_x[2:]:
        S *= d

    # ---- gt glue (mirrors the torch.no_grad() block) ----
    if gt.ndim != net_output.ndim:
        gt = gt.reshape((gt.shape[0], 1) + tuple(gt.shape[1:]))

    if apply_nonlin is not None:
        net_output = apply_nonlin(net_output)

    p_flat = net_output.reshape(B, C, S)

    if gt.shape == net_output.shape:
        # Dense (possibly soft) one-hot already provided: stream it as-is.
        from_labels = False
        t_in = gt.astype(net_output.dtype).reshape(B, C, S)
        t_block_rows = C
    else:
        # Integer label map: stream (B, 1, S) labels, build the one-hot in-kernel.
        from_labels = True
        lab_dtype = jnp.int8 if C <= 127 else jnp.int32
        t_in = gt.reshape(B, 1, S).astype(lab_dtype)
        t_block_rows = 1

    chunk = _choose_chunk(C * p_flat.dtype.itemsize,
                          t_block_rows * t_in.dtype.itemsize, S,
                          vmem_budget_bytes=vmem_budget_bytes, max_chunk=max_chunk)
    n_fold = chunk // 128
    n_k = pl.cdiv(S, chunk)

    # 2-way split of the spatial reduction when there is no batch parallelism
    # (keeps the second TensorCore busy on v7x for single-sample volumes).
    n_split = 2 if (B == 1 and n_k >= 2) else 1
    n_k_split = pl.cdiv(n_k, n_split)
    any_ragged = n_split * n_k_split * chunk > S

    kernel = functools.partial(
        _gdice_sums_kernel, n_classes=C, s_total=S, chunk=chunk, n_fold=n_fold,
        n_k_split=n_k_split, from_labels=from_labels, any_ragged=any_ragged)

    def data_map(s, b, k):
        kk = s * n_k_split + k
        return (b, 0, jnp.minimum(kk, n_k - 1))      # clamp keeps the DMA in-bounds

    sums = pl.pallas_call(
        kernel,
        out_shape=jax.ShapeDtypeStruct((n_split * B, 3, C, 128), jnp.float32),
        grid_spec=pltpu.PrefetchScalarGridSpec(
            num_scalar_prefetch=0,
            grid=(n_split, B, n_k_split),
            in_specs=[pl.BlockSpec((1, C, chunk), data_map),
                      pl.BlockSpec((1, t_block_rows, chunk), data_map)],
            out_specs=pl.BlockSpec((1, 3, C, 128),
                                   lambda s, b, k: (s * B + b, 0, 0, 0))),
        compiler_params=pltpu.CompilerParams(
            dimension_semantics=("parallel", "parallel", "arbitrary"),
            vmem_limit_bytes=_VMEM_LIMIT_BYTES),
    )(p_flat, t_in)

    # ---- tiny O(B*C) finish: generalized-Dice weighting and combine ----
    sums = sums.reshape(n_split, B, 3, C, 128).sum(axis=(0, 4))     # [B, 3, C]
    s_py, s_p, s_y = sums[:, 0], sums[:, 1], sums[:, 2]
    w = 1.0 / jnp.square(s_y + 1e-10)
    intersection = w * s_py
    union = w * (s_p + s_y)
    gdc = 1.0 - 2.0 * (jnp.sum(intersection, axis=1) + smooth) / (
        jnp.sum(union, axis=1) + smooth)
    return gdc


def _reference(net_output, gt, smooth=1e-5):
    """Pure-JAX mirror of the PyTorch GDiceLoss.forward."""
    B, C = net_output.shape[:2]
    if gt.ndim != net_output.ndim:
        gt = gt.reshape((gt.shape[0], 1) + tuple(gt.shape[1:]))
    if gt.shape == net_output.shape:
        y = gt.astype(jnp.float32)
    else:
        y = jax.nn.one_hot(gt[:, 0].astype(jnp.int32), C, axis=1, dtype=jnp.float32)
    p = net_output.astype(jnp.float32).reshape(B, C, -1)
    y = y.reshape(B, C, -1)
    s_y = y.sum(-1)
    s_p = p.sum(-1)
    s_py = (p * y).sum(-1)
    w = 1.0 / (s_y + 1e-10) ** 2
    intersection = w * s_py
    union = w * (s_p + s_y)
    return 1.0 - 2.0 * (intersection.sum(1) + smooth) / (union.sum(1) + smooth)


if __name__ == "__main__":
    key = jax.random.PRNGKey(0)
    k1, k2, k3, k4 = jax.random.split(key, 4)

    # Case 1: integer label map (the common path), B=2, C=4, 16x16 spatial.
    B, C, H, W = 2, 4, 16, 16
    logits = jax.random.normal(k1, (B, C, H, W), dtype=jnp.float32)
    net_output = jax.nn.softmax(logits, axis=1)
    gt = jax.random.randint(k2, (B, H, W), 0, C)
    loss = jax.block_until_ready(gdice_loss(net_output, gt, smooth=1e-5))
    ref = _reference(net_output, gt, smooth=1e-5)
    assert loss.shape == (B,)
    assert jnp.allclose(loss, ref, rtol=1e-4, atol=1e-6), (loss, ref)

    # Case 2: B=1 with a ragged spatial extent and a forced small chunk to exercise
    # the 2-way core-split + tail-masking path.
    B2, C2, H2, W2 = 1, 3, 13, 17
    logits2 = jax.random.normal(k3, (B2, C2, H2, W2), dtype=jnp.float32)
    p2 = jax.nn.softmax(logits2, axis=1)
    gt2 = jax.random.randint(k4, (B2, H2, W2), 0, C2)
    loss2 = jax.block_until_ready(gdice_loss(p2, gt2, max_chunk=128))
    ref2 = _reference(p2, gt2)
    assert jnp.allclose(loss2, ref2, rtol=1e-4, atol=1e-6), (loss2, ref2)

    # Case 3: gt already provided as a dense one-hot of the same shape (dense path).
    y3 = jax.nn.one_hot(gt, C, axis=1, dtype=net_output.dtype)
    loss3 = jax.block_until_ready(gdice_loss(net_output, y3))
    ref3 = _reference(net_output, y3)
    assert jnp.allclose(loss3, ref3, rtol=1e-4, atol=1e-6), (loss3, ref3)

    print("KERNEL_OK")
</pallas_src>

<mosaic_0001>
module attributes {stable_mosaic.version = 11 : i64} {
  func.func @_gdice_sums_kernel(%arg0: i32, %arg1: i32, %arg2: i32, %arg3: memref<1x4x256xf32, #tpu.memory_space<vmem>>, %arg4: memref<1x1x256xi8, #tpu.memory_space<vmem>>, %arg5: memref<1x3x4x128xf32, #tpu.memory_space<vmem>>) attributes {dimension_semantics = [#tpu.dimension_semantics<parallel>, #tpu.dimension_semantics<parallel>, #tpu.dimension_semantics<arbitrary>], iteration_bounds = array<i64: 1, 2, 1>, scalar_prefetch = 0 : i64, scratch_operands = 0 : i64, tpu.core_type = #tpu.core_type<tc>, window_params = [{transform_indices = @transform_0, window_bounds = array<i64: 1, 4, 256>}, {transform_indices = @transform_1, window_bounds = array<i64: 1, 1, 256>}, {transform_indices = @transform_2, window_bounds = array<i64: 1, 3, 4, 128>}]} {
    %c0_i32 = arith.constant 0 : i32
    %0 = arith.cmpi eq, %arg2, %c0_i32 : i32
    %1 = arith.extui %0 : i1 to i32
    %c0_i32_0 = arith.constant 0 : i32
    %2 = arith.cmpi ne, %1, %c0_i32_0 : i32
    scf.if %2 {
      %cst = arith.constant 0.000000e+00 : f32
      %70 = vector.broadcast %cst : f32 to vector<1x3x4x128xf32>
      %c0_56 = arith.constant 0 : index
      %c0_57 = arith.constant 0 : index
      %c0_58 = arith.constant 0 : index
      %c0_59 = arith.constant 0 : index
      %71 = vector.load %arg5[%c0_56, %c0_57, %c0_58, %c0_59] : memref<1x3x4x128xf32, #tpu.memory_space<vmem>>, vector<1x3x4x128xf32>
      tpu.vector_store %arg5[%c0_56, %c0_57, %c0_58, %c0_59], %70 {strides = array<i32>} : memref<1x3x4x128xf32, #tpu.memory_space<vmem>>, vector<1x3x4x128xf32>,
    } else {
    }
    %3 = tpu.iota {dimensions = array<i32: 0>} : vector<4x1xi32>
    %c0_i32_1 = arith.constant 0 : i32
    %c128_i32 = arith.constant 128 : i32
    %4 = arith.muli %c0_i32_1, %c128_i32 : i32
    %5 = tpu.assume_multiple %4, 128 : i32
    %c0 = arith.constant 0 : index
    %c0_2 = arith.constant 0 : index
    %6 = arith.index_cast %5 : i32 to index
    %7 = vector.load %arg3[%c0, %c0_2, %6] : memref<1x4x256xf32, #tpu.memory_space<vmem>>, vector<1x4x128xf32>
    %8 = vector.shape_cast %7 : vector<1x4x128xf32> to vector<4x128xf32>
    %c0_3 = arith.constant 0 : index
    %c0_4 = arith.constant 0 : index
    %9 = arith.index_cast %5 : i32 to index
    %10 = vector.load %arg4[%c0_3, %c0_4, %9] : memref<1x1x256xi8, #tpu.memory_space<vmem>>, vector<1x1x128xi8>
    %11 = vector.shape_cast %10 : vector<1x1x128xi8> to vector<1x128xi8>
    %12 = arith.extsi %11 : vector<1x128xi8> to vector<1x128xi32>
    %13 = vector.broadcast %12 : vector<1x128xi32> to vector<4x128xi32>
    %14 = vector.broadcast %3 : vector<4x1xi32> to vector<4x128xi32>
    %15 = arith.cmpi eq, %13, %14 : vector<4x128xi32>
    %16 = arith.extui %15 : vector<4x128xi1> to vector<4x128xi32>
    %17 = arith.sitofp %16 : vector<4x128xi32> to vector<4x128xf32>
    %c0_5 = arith.constant 0 : index
    %c0_6 = arith.constant 0 : index
    %c0_7 = arith.constant 0 : index
    %c0_8 = arith.constant 0 : index
    %18 = vector.load %arg5[%c0_5, %c0_6, %c0_7, %c0_8] : memref<1x3x4x128xf32, #tpu.memory_space<vmem>>, vector<1x1x4x128xf32>
    %19 = vector.shape_cast %18 : vector<1x1x4x128xf32> to vector<4x128xf32>
    %20 = arith.mulf %8, %17 : vector<4x128xf32>
    %21 = arith.addf %19, %20 : vector<4x128xf32>
    %c0_9 = arith.constant 0 : index
    %c0_10 = arith.constant 0 : index
    %c0_11 = arith.constant 0 : index
    %c0_12 = arith.constant 0 : index
    %22 = vector.load %arg5[%c0_9, %c0_10, %c0_11, %c0_12] : memref<1x3x4x128xf32, #tpu.memory_space<vmem>>, vector<1x1x4x128xf32>
    %23 = vector.shape_cast %22 : vector<1x1x4x128xf32> to vector<4x128xf32>
    %24 = vector.shape_cast %21 : vector<4x128xf32> to vector<1x1x4x128xf32>
    tpu.vector_store %arg5[%c0_9, %c0_10, %c0_11, %c0_12], %24 {strides = array<i32>} : memref<1x3x4x128xf32, #tpu.memory_space<vmem>>, vector<1x1x4x128xf32>,
    %c0_13 = arith.constant 0 : index
    %c1 = arith.constant 1 : index
    %c0_14 = arith.constant 0 : index
    %c0_15 = arith.constant 0 : index
    %25 = vector.load %arg5[%c0_13, %c1, %c0_14, %c0_15] : memref<1x3x4x128xf32, #tpu.memory_space<vmem>>, vector<1x1x4x128xf32>
    %26 = vector.shape_cast %25 : vector<1x1x4x128xf32> to vector<4x128xf32>
    %27 = arith.addf %26, %8 : vector<4x128xf32>
    %c0_16 = arith.constant 0 : index
    %c1_17 = arith.constant 1 : index
    %c0_18 = arith.constant 0 : index
    %c0_19 = arith.constant 0 : index
    %28 = vector.load %arg5[%c0_16, %c1_17, %c0_18, %c0_19] : memref<1x3x4x128xf32, #tpu.memory_space<vmem>>, vector<1x1x4x128xf32>
    %29 = vector.shape_cast %28 : vector<1x1x4x128xf32> to vector<4x128xf32>
    %30 = vector.shape_cast %27 : vector<4x128xf32> to vector<1x1x4x128xf32>
    tpu.vector_store %arg5[%c0_16, %c1_17, %c0_18, %c0_19], %30 {strides = array<i32>} : memref<1x3x4x128xf32, #tpu.memory_space<vmem>>, vector<1x1x4x128xf32>,
    %c0_20 = arith.constant 0 : index
    %c2 = arith.constant 2 : index
    %c0_21 = arith.constant 0 : index
    %c0_22 = arith.constant 0 : index
    %31 = vector.load %arg5[%c0_20, %c2, %c0_21, %c0_22] : memref<1x3x4x128xf32, #tpu.memory_space<vmem>>, vector<1x1x4x128xf32>
    %32 = vector.shape_cast %31 : vector<1x1x4x128xf32> to vector<4x128xf32>
    %33 = arith.addf %32, %17 : vector<4x128xf32>
    %c0_23 = arith.constant 0 : index
    %c2_24 = arith.constant 2 : index
    %c0_25 = arith.constant 0 : index
    %c0_26 = arith.constant 0 : index
    %34 = vector.load %arg5[%c0_23, %c2_24, %c0_25, %c0_26] : memref<1x3x4x128xf32, #tpu.memory_space<vmem>>, vector<1x1x4x128xf32>
    %35 = vector.shape_cast %34 : vector<1x1x4x128xf32> to vector<4x128xf32>
    %36 = vector.shape_cast %33 : vector<4x128xf32> to vector<1x1x4x128xf32>
    tpu.vector_store %arg5[%c0_23, %c2_24, %c0_25, %c0_26], %36 {strides = array<i32>} : memref<1x3x4x128xf32, #tpu.memory_space<vmem>>, vector<1x1x4x128xf32>,
    %c1_i32 = arith.constant 1 : i32
    %c128_i32_27 = arith.constant 128 : i32
    %37 = arith.muli %c1_i32, %c128_i32_27 : i32
    %38 = tpu.assume_multiple %37, 128 : i32
    %c0_28 = arith.constant 0 : index
    %c0_29 = arith.constant 0 : index
    %39 = arith.index_cast %38 : i32 to index
    %40 = vector.load %arg3[%c0_28, %c0_29, %39] : memref<1x4x256xf32, #tpu.memory_space<vmem>>, vector<1x4x128xf32>
    %41 = vector.shape_cast %40 : vector<1x4x128xf32> to vector<4x128xf32>
    %c0_30 = arith.constant 0 : index
    %c0_31 = arith.constant 0 : index
    %42 = arith.index_cast %38 : i32 to index
    %43 = vector.load %arg4[%c0_30, %c0_31, %42] : memref<1x1x256xi8, #tpu.memory_space<vmem>>, vector<1x1x128xi8>
    %44 = vector.shape_cast %43 : vector<1x1x128xi8> to vector<1x128xi8>
    %45 = arith.extsi %44 : vector<1x128xi8> to vector<1x128xi32>
    %46 = vector.broadcast %45 : vector<1x128xi32> to vector<4x128xi32>
    %47 = vector.broadcast %3 : vector<4x1xi32> to vector<4x128xi32>
    %48 = arith.cmpi eq, %46, %47 : vector<4x128xi32>
    %49 = arith.extui %48 : vector<4x128xi1> to vector<4x128xi32>
    %50 = arith.sitofp %49 : vector<4x128xi32> to vector<4x128xf32>
    %c0_32 = arith.constant 0 : index
    %c0_33 = arith.constant 0 : index
    %c0_34 = arith.constant 0 : index
    %c0_35 = arith.constant 0 : index
    %51 = vector.load %arg5[%c0_32, %c0_33, %c0_34, %c0_35] : memref<1x3x4x128xf32, #tpu.memory_space<vmem>>, vector<1x1x4x128xf32>
    %52 = vector.shape_cast %51 : vector<1x1x4x128xf32> to vector<4x128xf32>
    %53 = arith.mulf %41, %50 : vector<4x128xf32>
    %54 = arith.addf %52, %53 : vector<4x128xf32>
    %c0_36 = arith.constant 0 : index
    %c0_37 = arith.constant 0 : index
    %c0_38 = arith.constant 0 : index
    %c0_39 = arith.constant 0 : index
    %55 = vector.load %arg5[%c0_36, %c0_37, %c0_38, %c0_39] : memref<1x3x4x128xf32, #tpu.memory_space<vmem>>, vector<1x1x4x128xf32>
    %56 = vector.shape_cast %55 : vector<1x1x4x128xf32> to vector<4x128xf32>
    %57 = vector.shape_cast %54 : vector<4x128xf32> to vector<1x1x4x128xf32>
    tpu.vector_store %arg5[%c0_36, %c0_37, %c0_38, %c0_39], %57 {strides = array<i32>} : memref<1x3x4x128xf32, #tpu.memory_space<vmem>>, vector<1x1x4x128xf32>,
    %c0_40 = arith.constant 0 : index
    %c1_41 = arith.constant 1 : index
    %c0_42 = arith.constant 0 : index
    %c0_43 = arith.constant 0 : index
    %58 = vector.load %arg5[%c0_40, %c1_41, %c0_42, %c0_43] : memref<1x3x4x128xf32, #tpu.memory_space<vmem>>, vector<1x1x4x128xf32>
    %59 = vector.shape_cast %58 : vector<1x1x4x128xf32> to vector<4x128xf32>
    %60 = arith.addf %59, %41 : vector<4x128xf32>
    %c0_44 = arith.constant 0 : index
    %c1_45 = arith.constant 1 : index
    %c0_46 = arith.constant 0 : index
    %c0_47 = arith.constant 0 : index
    %61 = vector.load %arg5[%c0_44, %c1_45, %c0_46, %c0_47] : memref<1x3x4x128xf32, #tpu.memory_space<vmem>>, vector<1x1x4x128xf32>
    %62 = vector.shape_cast %61 : vector<1x1x4x128xf32> to vector<4x128xf32>
    %63 = vector.shape_cast %60 : vector<4x128xf32> to vector<1x1x4x128xf32>
    tpu.vector_store %arg5[%c0_44, %c1_45, %c0_46, %c0_47], %63 {strides = array<i32>} : memref<1x3x4x128xf32, #tpu.memory_space<vmem>>, vector<1x1x4x128xf32>,
    %c0_48 = arith.constant 0 : index
    %c2_49 = arith.constant 2 : index
    %c0_50 = arith.constant 0 : index
    %c0_51 = arith.constant 0 : index
    %64 = vector.load %arg5[%c0_48, %c2_49, %c0_50, %c0_51] : memref<1x3x4x128xf32, #tpu.memory_space<vmem>>, vector<1x1x4x128xf32>
    %65 = vector.shape_cast %64 : vector<1x1x4x128xf32> to vector<4x128xf32>
    %66 = arith.addf %65, %50 : vector<4x128xf32>
    %c0_52 = arith.constant 0 : index
    %c2_53 = arith.constant 2 : index
    %c0_54 = arith.constant 0 : index
    %c0_55 = arith.constant 0 : index
    %67 = vector.load %arg5[%c0_52, %c2_53, %c0_54, %c0_55] : memref<1x3x4x128xf32, #tpu.memory_space<vmem>>, vector<1x1x4x128xf32>
    %68 = vector.shape_cast %67 : vector<1x1x4x128xf32> to vector<4x128xf32>
    %69 = vector.shape_cast %66 : vector<4x128xf32> to vector<1x1x4x128xf32>
    tpu.vector_store %arg5[%c0_52, %c2_53, %c0_54, %c0_55], %69 {strides = array<i32>} : memref<1x3x4x128xf32, #tpu.memory_space<vmem>>, vector<1x1x4x128xf32>,
    %c2_i32 = arith.constant 2 : i32
    return
  }
  func.func @transform_0(%arg0: i32, %arg1: i32, %arg2: i32) -> (i32, i32, i32) {
    %c1_i32 = arith.constant 1 : i32
    %0 = arith.muli %arg0, %c1_i32 : i32
    %1 = arith.addi %0, %arg2 : i32
    %c0_i32 = arith.constant 0 : i32
    %2 = arith.minsi %1, %c0_i32 : i32
    %c0_i32_0 = arith.constant 0 : i32
    %c0_i32_1 = arith.constant 0 : i32
    return %arg1, %c0_i32_0, %2 : i32, i32, i32
  }
  func.func @transform_1(%arg0: i32, %arg1: i32, %arg2: i32) -> (i32, i32, i32) {
    %c1_i32 = arith.constant 1 : i32
    %0 = arith.muli %arg0, %c1_i32 : i32
    %1 = arith.addi %0, %arg2 : i32
    %c0_i32 = arith.constant 0 : i32
    %2 = arith.minsi %1, %c0_i32 : i32
    %c0_i32_0 = arith.constant 0 : i32
    %c0_i32_1 = arith.constant 0 : i32
    return %arg1, %c0_i32_0, %2 : i32, i32, i32
  }
  func.func @transform_2(%arg0: i32, %arg1: i32, %arg2: i32) -> (i32, i32, i32, i32) {
    %c2_i32 = arith.constant 2 : i32
    %0 = arith.muli %arg0, %c2_i32 : i32
    %1 = arith.addi %0, %arg1 : i32
    %c0_i32 = arith.constant 0 : i32
    %c0_i32_0 = arith.constant 0 : i32
    %c0_i32_1 = arith.constant 0 : i32
    %c0_i32_2 = arith.constant 0 : i32
    return %1, %c0_i32, %c0_i32_0, %c0_i32_1 : i32, i32, i32, i32
  }
}

</mosaic_0001>

<bundles_post_ra>
// kernel: tpu_custom_call.1
= control target key start
LH: loop header
LB: loop body
LE: loop exit
PB: predicated region body
PF: predicated region fallthrough
CT: control target
= control target key end

     0   :  { %7 = vsyncpa [#allocation3], 0  ;;  %s858_s0 = inlined_call_operand.hbm [shape: f32[2,4,256], index: 0, kind: input, shape index: {}]   ;;  %s859_s1 = inlined_call_operand.vmem [shape: s8[2,1,256], index: 1, kind: input, shape index: {}]   ;;  %s860_s2 = inlined_call_operand.hbm [shape: f32[2,3,4,128], index: 2, kind: output, shape index: {}]  }
   0x1   :  { %9 = vsyncpa [#allocation3 + $0x1], 0 }
   0x2   :  { %10 = vsyncpa [#allocation4], 0 }
   0x3   :  { %12 = vsyncpa [#allocation4 + $0x1], 0  ;;  %s656_s9 = smov 0   ;;  %s658_s10 = smov 0  }
   0x4   :  { %s660_s11 = smov 0   ;;  %s662_s12 = smov 0  }
   0x5   :  { %s664_s13 = smov 0   ;;  %s666_s14 = smov 0  }
   0x6 LB: > { %s429_s15 = sadd.s32 4294967295, %s634_s14   ;;  %s430_s16 = sadd.s32 4294967294, %s634_s14   ;;  %s634_s14 = sphi %s666_s14, %s18_s14   ;;  %s630_s13 = sphi %s664_s13, %s876_s13   ;;  %s626_s12 = sphi %s662_s12, %s875_s12   ;;  %s622_s11 = sphi %s660_s11, %s874_s11   ;;  %s618_s10 = sphi %s658_s10, %s873_s10   ;;  %s614_s9 = sphi %s656_s9, %s872_s9  }
   0x7   : > { %s33_s17 = sadd.s32 1, %s630_s13  ;;  %s52_s18 = sadd.s32 1, %s622_s11 }
   0x8   : > { %p35_p0 = scmp.ge.s32.totalorder %s33_s17, 2  ;;  %p59_p1 = scmp.ne.s32.totalorder %s622_s11, %s618_s10 }
   0x9   : > { %p60_p2 = scmp.eq.s32.totalorder %s634_s14, 0  ;;  %p65_p3 = scmp.ne.s32.totalorder %s618_s10, %s614_s9 }
   0xa   : > { %s878_s17 = smov (%p35_p0, %s33_s17), 0  ;;  %p66_p5 = scmp.eq.s32.totalorder %s429_s15, 0 }
   0xb   : > { %p697_p4 = por %p60_p2, %p59_p1  ;;  %s47_s20 = ssub.s32 %s630_s13, %s878_s17 }
   0xc   : > { %p127_p6 = scmp.eq.s32.totalorder %s429_s15, 1  ;;  %p50_p7 = scmp.eq.s32.totalorder %s47_s20, 0 }
   0xd   : > { %p703_p8 = por %p66_p5, %p65_p3  ;;  %p133_p10 = scmp.eq.s32.totalorder %s430_s16, 1 }
   0xe   : > { %p707_p9 = por %p127_p6, %p59_p1  ;;  %p469_p13 = scmp.lt.s32.totalorder %s634_s14, 2 }
   0xf   : > { %s712_s23 = scalar_select %p50_p7, %s622_s11, %s52_s18  }
  0x10   : > { %s864_s22 = scalar_select %p707_p9, 1, 0 }
  0x11   : > { %p714_p11 = por %p133_p10, %p65_p3  ;;  %s153_s25 = sand.u32 1, %s622_s11  }
  0x12   : > { %s433_s26 = sshll.u32 %s153_s25, 3  ;;  %s454_s27 = sshll.u32 %s630_s13, 7 }
  0x13   : > { %s865_s24 = scalar_select %p714_p11, 1, 0 }
  0x14   : > { %s725_s30 = scalar_lea.hbm %s858_s0, %s454_s27  ;;  %s157_s3 = scalar_lea.vmem [#allocation2], %s433_s26 }
  0x15   : > { %s170_s4 = sshll.u32 %s157_s3, 4  ;;  %p731_p0 = pnand %p469_p13, %p697_p4  ;;  %s727_s4 = int_to_ptr.vmem [resolvable:$true] %s170_s4 }
  0x16   : > { %s154_s6 = scalar_lea.sflag [#allocation3], %s153_s25  ;;  %s522_s7 = scalar_lea.hbm %s725_s30, 128 }
  0x17   : > { %p523_p3 = scmp.ne.s32.totalorder %s725_s30, %s522_s7  ;;  %p524_p5 = pneg %p731_p0 }
  0x18   : > { %s527_s16 = scalar_lea.hbm %s858_s0, 256  ;;  %p528_p4 = scmp.lt.u32.totalorder %s725_s30, %s858_s0 }
  0x19   : > { %p525_p6 = pnand %p524_p5, %p523_p3  ;;  %p529_p10 = scmp.lt.u32.totalorder %s527_s16, %s522_s7 }
  0x1a   : > { %p531_p12 = scmp.lt.u32.totalorder %s522_s7, %s725_s30 }
  0x1b   : > { %p526_p7 = pneg %p525_p6  ;;  %p530_p13 = por %p529_p10, %p528_p4 }
  0x1d   : > { %p532_p1 = por %p531_p12, %p530_p13 }
  0x1f   : > { %p533_p2 = pnand %p532_p1, %p526_p7 }
  0x21   : > { %536 = shalt.err (!%p533_p2)
}
  0x22   : > { %s537_s20 = scalar_lea.vmem %s727_s4, 128  ;;  %s636_s25 = smov [#allocation2]  }
  0x23   : > { %p538_p3 = scmp.ne.s32.totalorder %s727_s4, %s537_s20  ;;  %s542_s26 = sshll.u32 %s636_s25, 4  ;;  %s543_s26 = int_to_ptr.vmem [resolvable:$false] %s542_s26 }
  0x24   : > { %s544_s27 = scalar_lea.vmem %s543_s26, 256  ;;  %p545_p9 = scmp.lt.s32.totalorder %s727_s4, %s543_s26 }
  0x25   : > { %p540_p6 = pnand %p538_p3, %p524_p5  ;;  %p546_p4 = scmp.lt.s32.totalorder %s544_s27, %s537_s20 }
  0x27   : > { %p541_p11 = pneg %p540_p6  ;;  %p547_p10 = por %p546_p4, %p545_p9 }
  0x29   : > { %p548_p12 = pnand %p547_p10, %p541_p11 }
  0x2b   : > { %551 = shalt.err (!%p548_p12)
}
  0x2c   : > { %464 = dma.hbm_to_vmem [thread:$0]  (!%p731_p0), %s725_s30, 128, %s727_s4, %s154_s6  }
  0x2d   : > { %p867_p1 = scmp.lt.s32.totalorder %s634_s14, 3  ;;  %p868_p2 = scmp.ge.s32.totalorder %s634_s14, 1 }
  0x2f   : > { %p194_p5 = pnand %p868_p2, %p867_p1 }
  0x30   : > { %s767_s28 = sand.u32 (!%p194_p5), 1, %s618_s10  }
  0x31   : > { %197 = sbr.rel (%p194_p5) target bundleno = 99 (0x63), region = 28  ;;  %s437_s29 = sshll.u32 (!%p194_p5), %s767_s28, 3 }
  0x32   : > { %s200_s3 = scalar_lea.sflag (!%p194_p5), [#allocation3], %s767_s28  ;;  %s771_s7 = scalar_lea.vmem (!%p194_p5), [#allocation2], %s437_s29 }
  0x38   : > { %605 = dma.done.wait (%p703_p8), %s200_s3, 128  }
  0x39   : > { %607 = vsyncadd (%p703_p8), %s200_s3, 4294967168  ;;  %s455_s30 = smul.u32 12, %s767_s28  ;;  %p243_p9 = scmp.lt.s32.totalorder %s626_s12, 1  ;;  %v263_v0 = vlaneseq  ;;  %v637_v2 = vmov 0.0   ;;  %v265_v8 = vld [vmem:[%s771_s7] sm:$0xf] }
  0x3a   : > { %v444_v20 = vld [vmem:[%s771_s7 + $0x4] sm:$0xf]  ;;  %s456_s16 = smul.u32 192, %s626_s12  ;;  %p869_p11 = scmp.ne.s32.totalorder %s864_s22, 0 }
  0x3b   : > { %v264_v1 = vshrl.u32 %v263_v0, 7  ;;  %s244_s4 = scalar_select %p243_p9, %s626_s12, 1 }
  0x3c   : > { %s780_s5 = scalar_lea.vmem [#allocation5], %s455_s30  ;;  %s805_s25 = scalar_lea.hbm %s860_s2, %s456_s16 }
  0x3d   : > { %260 = vst [vmem:[%s780_s5] sm:$0xf] %v637_v2  ;;  %261 = vst [vmem:[%s780_s5 + $0x4] sm:$0xf] %v637_v2  ;;  %s438_s21 = sshll.u32 %s244_s4, 1  ;;  %v270_v3 = vsub.s32 0, %v264_v1  ;;  %s325_s18 = sshll.u32 %s780_s5, 4  ;;  %s808_s18 = int_to_ptr.vmem [resolvable:$true] %s325_s18 }
  0x3e   : > { %262 = vst [vmem:[%s780_s5 + $0x8] sm:$0xf] %v637_v2  ;;  %s249_s15 = scalar_lea.vmem %s859_s1, %s438_s21  ;;  %s310_s12 = scalar_lea.sflag [#allocation4], %s767_s28 }
  0x3f   : > { %v445_v4 = vld [vmem:[%s249_s15 + $0x1] sm:$0x1]  ;;  %v266_v5 = vld [vmem:[%s249_s15] sm:$0x1]  ;;  %s552_s26 = scalar_lea.vmem %s808_s18, 192  ;;  %s638_s27 = smov [#allocation5]  }
  0x40   : > { %v291_v6 = vunpack.c.0.s8 %v445_v4  ;;  %v267_v7 = vunpack.c.0.s8 %v266_v5  ;;  %p553_p8 = scmp.ne.s32.totalorder %s808_s18, %s552_s26  ;;  %s556_s29 = sshll.u32 %s638_s27, 4  ;;  %s557_s29 = int_to_ptr.vmem [resolvable:$false] %s556_s29 }
  0x41   : > { %s558_s3 = scalar_lea.vmem %s557_s29, 384  ;;  %p559_p13 = scmp.lt.s32.totalorder %s808_s18, %s557_s29 }
  0x42   : > { %v271_v9 = vrot.slane %v267_v7, %v270_v3  ;;  %v295_v13 = vrot.slane %v291_v6, %v270_v3  ;;  %p554_p0 = pnand %p553_p8, %p869_p11  ;;  %p560_p3 = scmp.lt.s32.totalorder %s558_s3, %s552_s26 }
  0x44   : > { %v440_v10 = vld [vmem:[%s780_s5 + $0x4] sm:$0xf]  ;;  %vm272_vm0 = vcmp.eq.s32.totalorder %v271_v9, %v264_v1  ;;  %v275_v15 = vld [vmem:[%s780_s5] sm:$0xf]  ;;  %vm296_vm1 = vcmp.eq.s32.totalorder %v295_v13, %v264_v1  ;;  %p555_p7 = pneg %p554_p0  ;;  %p561_p6 = por %p560_p3, %p559_p13 }
  0x45   : > { %v281_v11 = vadd.f32 %v440_v10, %v265_v8  ;;  %v442_v12 = vld [vmem:[%s780_s5 + $0x8] sm:$0xf]  ;;  %v439_v14 = vsel %vm272_vm0, 1.0, %v637_v2  ;;  %v446_v19 = vsel %vm296_vm1, 1.0, %v637_v2 }
  0x46   : > { %v276_v16 = vmul.f32 %v439_v14, %v265_v8  ;;  %v285_v17 = vadd.f32 %v442_v12, %v439_v14  ;;  %v300_v23 = vmul.f32 %v446_v19, %v444_v20  ;;  %p562_p4 = pnand %p561_p6, %p555_p7 }
  0x47   : > { %441 = vst [vmem:[%s780_s5 + $0x4] sm:$0xf] %v281_v11 }
  0x48   : > { %v277_v18 = vadd.f32 %v276_v16, %v275_v15  ;;  %443 = vst [vmem:[%s780_s5 + $0x8] sm:$0xf] %v285_v17 }
  0x4a   : > { %278 = vst [vmem:[%s780_s5] sm:$0xf] %v277_v18 }
  0x4e   : > { %v447_v21 = vld [vmem:[%s780_s5 + $0x4] sm:$0xf] }
  0x4f   : > { %v304_v22 = vadd.f32 %v447_v21, %v444_v20  ;;  %v449_v24 = vld [vmem:[%s780_s5 + $0x8] sm:$0xf] }
  0x50   : > { %v307_v25 = vadd.f32 %v449_v24, %v446_v19 }
  0x51   : > { %448 = vst [vmem:[%s780_s5 + $0x4] sm:$0xf] %v304_v22  ;;  %v299_v26 = vld [vmem:[%s780_s5] sm:$0xf] }
  0x52   : > { %v301_v27 = vadd.f32 %v300_v23, %v299_v26  ;;  %450 = vst [vmem:[%s780_s5 + $0x8] sm:$0xf] %v307_v25 }
  0x54   : > { %302 = vst [vmem:[%s780_s5] sm:$0xf] %v301_v27 }
  0x55   : > { %565 = shalt.err (!%p562_p4)
}
  0x56   : > { %s566_s7 = scalar_lea.hbm %s805_s25, 192  ;;  %s570_s5 = scalar_lea.hbm %s860_s2, 384 }
  0x57   : > { %p567_p10 = scmp.ne.s32.totalorder %s805_s25, %s566_s7  ;;  %p571_p2 = scmp.lt.u32.totalorder %s805_s25, %s860_s2 }
  0x58   : > { %p572_p5 = scmp.lt.u32.totalorder %s570_s5, %s566_s7  ;;  %p574_p8 = scmp.lt.u32.totalorder %s566_s7, %s805_s25 }
  0x59   : > { %p568_p12 = pnand %p567_p10, %p869_p11 }
  0x5a   : > { %p573_p9 = por %p572_p5, %p571_p2 }
  0x5b   : > { %p569_p1 = pneg %p568_p12 }
  0x5c   : > { %p575_p0 = por %p574_p8, %p573_p9 }
  0x5e   : > { %p576_p7 = pnand %p575_p0, %p569_p1 }
  0x60   : > { %579 = shalt.err (!%p576_p7)
}
  0x61   : > { %s639_s8 = smov 64   ;;  %s640_s15 = smov 4  }
  0x62   : > { %459 = dma.vmem_to_hbm [thread:$0]  (%p869_p11), %s808_s18, 192, %s805_s25, %s310_s12, %s639_s8, %s639_s8, %s640_s15  }
  0x63 PF: > { %s340_s16 = sand.u32 1, %s614_s9   ;;  %p870_p13 = scmp.ne.s32.totalorder %s865_s24, 0 }
  0x64   : > { %p871_p3 = scmp.ge.s32.totalorder %s634_s14, 2  ;;  %s341_s19 = scalar_lea.sflag [#allocation4], %s340_s16 }
  0x66   : > { %p466_p6 = pnand %p871_p3, %p870_p13 }
  0x68   : > { %609 = dma.done.wait (!%p466_p6), %s341_s19, 192  }
  0x69   : > { %611 = vsyncadd (!%p466_p6), %s341_s19, 4294967104  ;;  %s18_s14 = sadd.s32 1, %s634_s14   ;;  %s872_s9 = smov %s618_s10 }
  0x6a   : > { %p15_p4 = scmp.ge.s32.totalorder %s18_s14, 4   ;;  %s873_s10 = smov %s622_s11 }
  0x6b   : > { %s874_s11 = smov %s712_s23  ;;  %s875_s12 = smov %s630_s13 }
  0x6c   : > { %s876_s13 = smov %s878_s17  ;;  %17 = sbr.rel (!%p15_p4) target bundleno = 6 (0x6), region = 84 }
  0x73   :  { %346 = vsyncpa [#allocation3], 1 }
  0x74   :  { %348 = vsyncpa [#allocation3 + $0x1], 1 }
  0x75   :  { %349 = vsyncpa [#allocation4], 1 }
  0x76   :  { %351 = vsyncpa [#allocation4 + $0x1], 1 }

</bundles_post_ra>
